<compile_context>
chip_gen: v7x
topology: tpu7x:2x2x1
jax: 0.10.0
libtpu: 0.0.40
codegen_flags: <defaults>
</compile_context>

<pallas_src>
import jax
import jax.numpy as jnp
from jax.experimental import pallas as pl
from jax.experimental.pallas import tpu as pltpu


def _round_up(x, m):
    return ((x + m - 1) // m) * m


def attention_head_kernel(f_ref, ww_ref, wb_ref, v_ref, o_ref):
    # f_ref : (TB, S, H)   features, H un-padded (ragged K masked by Mosaic)
    # ww_ref: (H, Dp)      W weight, pre-transposed, D padded to lane width
    # wb_ref: (1, Dp)      W bias, padded
    # v_ref : (1, Dp)      V weight row, padded
    # o_ref : (1, TB, H)   pooled context vectors
    TB, S, H = f_ref.shape
    x = f_ref[...]                                  # (TB, S, H)
    # Merge (TB, S) into the MXU M dim; free view when S % 8 == 0 (sublane
    # aligned), which the default shapes satisfy.
    x2 = x.reshape(TB * S, H)

    # att = tanh(x @ W^T + b_W): one lane-dense MXU matmul over all TB*S rows.
    att = jnp.tanh(
        jnp.dot(x2, ww_ref[...], preferred_element_type=jnp.float32) + wb_ref[...]
    )

    # score = att @ V^T: rank-1 output -> VPU multiply + lane reduce instead of
    # an N=1 MXU matmul.  V's bias is omitted: softmax over the sequence axis
    # is invariant to a constant shift of the scores.
    score = jnp.sum(att * v_ref[...], axis=-1, keepdims=True)   # (TB*S, 1)
    score = score.reshape(TB, S, 1)

    # Per-batch-row softmax over the sequence axis (exact normalization).
    m = jnp.max(score, axis=1, keepdims=True)       # (TB, 1, 1)
    e = jnp.exp(score - m)                          # (TB, S, 1)
    denom = jnp.sum(e, axis=1, keepdims=True)       # (TB, 1, 1)
    attn = e / denom                                # (TB, S, 1)

    # context = sum_s attn[s] * x[s]
    ctx = jnp.sum(attn * x, axis=1)                 # (TB, H)
    o_ref[...] = ctx.reshape(1, TB, H).astype(o_ref.dtype)


def _choose_batch_tile(B, S, H, Dp, itemsize, vmem_cap):
    """Pick (TB, padded_B) from a generation-aware VMEM budget."""
    # Per-step VMEM cost model (bytes): features + output double-buffered,
    # weights single-buffered, att / softmax temporaries.
    static = itemsize * (H * Dp + 2 * Dp)
    per_row = itemsize * (2 * S * H + 2 * H + 2 * S * Dp + 8 * S)
    budget = int(0.6 * vmem_cap)
    tb_vmem = max(1, (budget - static) // per_row)
    # Keep a single feature tile around a few MiB; aim for >= 512 MXU M rows.
    tb_tile = max(1, (8 << 20) // max(1, itemsize * S * H))
    tb = min(B, tb_vmem, tb_tile)
    tb = max(tb, min(B, tb_vmem, pl.cdiv(512, S)))
    if B >= 2:
        # >= 2 grid steps so the "parallel" batch axis can shard across v7x's
        # two TensorCores (cheap on 1-TC chips).
        tb = min(tb, max(1, B // 2))
    tb = max(1, tb)

    # Prefer a TB that divides B (no batch padding / wasted HBM traffic).
    div = 1
    for cand in range(tb, 0, -1):
        if B % cand == 0:
            div = cand
            break
    if div * 2 >= tb:
        return div, B
    # Divisor is much smaller than target: accept a small batch pad instead.
    bp = _round_up(B, tb)
    if (bp - B) * 8 <= bp:          # <= 12.5% wasted rows
        return tb, bp
    return div, B


def attention_head(features, w_weight, w_bias, v_weight, v_bias):
    """features: (B, S, H) float32.
    w_weight: (D, H)  (PyTorch layout, out x in)
    w_bias:   (D,)
    v_weight: (1, D)
    v_bias:   (1,)   (mathematically irrelevant to the output; kept for API parity)
    returns:  (B, H)
    """
    del v_bias  # softmax over the sequence axis is shift-invariant
    B, S, H = features.shape
    D = w_weight.shape[0]
    Dp = _round_up(D, 128)                      # lane-dense hidden dim (weights only)
    itemsize = jnp.dtype(features.dtype).itemsize

    try:
        vmem_cap = int(pltpu.get_tpu_info().vmem_capacity_bytes)
    except Exception:
        vmem_cap = 64 * 1024 * 1024             # conservative (v7x-sized) fallback

    TB, Bp = _choose_batch_tile(B, S, H, Dp, itemsize, vmem_cap)
    G = Bp // TB

    # Features are passed through untouched (no HBM pad copy of the dominant
    # tensor) unless a small batch pad was chosen above.
    f = features if Bp == B else jnp.pad(features, ((0, Bp - B), (0, 0), (0, 0)))
    # Only the small weights are padded / transposed (cheap; cacheable by caller).
    ww = jnp.pad(w_weight.T, ((0, 0), (0, Dp - D)))                 # (H, Dp)
    wb = jnp.pad(w_bias, (0, Dp - D)).reshape(1, Dp)                # (1, Dp)
    v = jnp.pad(v_weight.reshape(D), (0, Dp - D)).reshape(1, Dp)    # (1, Dp)

    # Scoped-VMEM limit from the same cost model, clamped to the chip's VMEM.
    static = itemsize * (H * Dp + 2 * Dp)
    per_row = itemsize * (2 * S * H + 2 * H + 2 * S * Dp + 8 * S)
    est = static + TB * per_row
    vmem_limit = int(min(max(2 * est, 32 * 1024 * 1024), int(0.85 * vmem_cap)))
    vmem_limit = max(vmem_limit, est)

    def run(single_buffer_weights):
        wkw = {"pipeline_mode": pl.Buffered(1)} if single_buffer_weights else {}
        return pl.pallas_call(
            attention_head_kernel,
            out_shape=jax.ShapeDtypeStruct((G, TB, H), features.dtype),
            grid_spec=pltpu.PrefetchScalarGridSpec(
                num_scalar_prefetch=0,
                grid=(G,),
                in_specs=[
                    pl.BlockSpec((TB, S, H), lambda b: (b, 0, 0)),
                    pl.BlockSpec((H, Dp), lambda b: (0, 0), **wkw),
                    pl.BlockSpec((1, Dp), lambda b: (0, 0), **wkw),
                    pl.BlockSpec((1, Dp), lambda b: (0, 0), **wkw),
                ],
                out_specs=pl.BlockSpec((1, TB, H), lambda b: (b, 0, 0)),
            ),
            compiler_params=pltpu.CompilerParams(
                dimension_semantics=("parallel",),
                vmem_limit_bytes=vmem_limit,
            ),
        )(f, ww, wb, v)

    try:
        out = run(True)          # grid-invariant weights single-buffered
    except Exception:
        out = run(False)         # fallback if Buffered(1) is rejected by Mosaic

    return out.reshape(Bp, H)[:B]


def attention_head_ref(features, w_weight, w_bias, v_weight, v_bias):
    """Pure-JAX reference mirroring the PyTorch forward."""
    att = jnp.tanh(jnp.einsum("bsh,dh->bsd", features, w_weight) + w_bias)
    score = jnp.einsum("bsd,od->bso", att, v_weight) + v_bias  # (B, S, 1)
    attn = jax.nn.softmax(score, axis=1)
    return jnp.sum(attn * features, axis=1)


if __name__ == "__main__":
    B, S, H, D = 2, 8, 32, 64  # small shapes: batch, seq, h_size, hidden_dim

    key = jax.random.PRNGKey(0)
    k_f, k_ww, k_wb, k_vw, k_vb = jax.random.split(key, 5)

    features = jax.random.normal(k_f, (B, S, H), dtype=jnp.float32)
    w_weight = jax.random.normal(k_ww, (D, H), dtype=jnp.float32) * 0.1
    w_bias = jax.random.normal(k_wb, (D,), dtype=jnp.float32) * 0.1
    v_weight = jax.random.normal(k_vw, (1, D), dtype=jnp.float32) * 0.1
    v_bias = jax.random.normal(k_vb, (1,), dtype=jnp.float32) * 0.1

    out = attention_head(features, w_weight, w_bias, v_weight, v_bias)
    out = jax.block_until_ready(out)

    ref = attention_head_ref(features, w_weight, w_bias, v_weight, v_bias)
    assert out.shape == (B, H)
    assert jnp.allclose(out, ref, atol=1e-4, rtol=1e-4), "mismatch vs reference"

    print("KERNEL_OK")
</pallas_src>

<mosaic_0001>
module attributes {stable_mosaic.version = 11 : i64} {
  func.func @attention_head_kernel(%arg0: i32, %arg1: memref<1x8x32xf32, #tpu.memory_space<vmem>>, %arg2: memref<32x128xf32, #tpu.memory_space<vmem>>, %arg3: memref<1x128xf32, #tpu.memory_space<vmem>>, %arg4: memref<1x128xf32, #tpu.memory_space<vmem>>, %arg5: memref<1x1x32xf32, #tpu.memory_space<vmem>>) attributes {dimension_semantics = [#tpu.dimension_semantics<parallel>], iteration_bounds = array<i64: 2>, scalar_prefetch = 0 : i64, scratch_operands = 0 : i64, tpu.core_type = #tpu.core_type<tc>, window_params = [{transform_indices = @transform_0, window_bounds = array<i64: 1, 8, 32>}, {pipeline_mode = #tpu.pipeline_mode<synchronous>, transform_indices = @transform_1, window_bounds = array<i64: 32, 128>}, {pipeline_mode = #tpu.pipeline_mode<synchronous>, transform_indices = @transform_2, window_bounds = array<i64: 1, 128>}, {pipeline_mode = #tpu.pipeline_mode<synchronous>, transform_indices = @transform_3, window_bounds = array<i64: 1, 128>}, {transform_indices = @transform_4, window_bounds = array<i64: 1, 1, 32>}]} {
    %c0 = arith.constant 0 : index
    %c0_0 = arith.constant 0 : index
    %c0_1 = arith.constant 0 : index
    %0 = vector.load %arg1[%c0, %c0_0, %c0_1] : memref<1x8x32xf32, #tpu.memory_space<vmem>>, vector<1x8x32xf32>
    %1 = vector.shape_cast %0 : vector<1x8x32xf32> to vector<8x32xf32>
    %c0_2 = arith.constant 0 : index
    %c0_3 = arith.constant 0 : index
    %2 = vector.load %arg2[%c0_2, %c0_3] : memref<32x128xf32, #tpu.memory_space<vmem>>, vector<32x128xf32>
    %cst = arith.constant dense<0.000000e+00> : vector<8x128xf32>
    %3 = tpu.matmul %1, %2, %cst {dimension_numbers = #tpu.dot_dimension_numbers<[1], [0], [0], [1], [0, 0, 1, 1], [], []>} : vector<8x32xf32>, vector<32x128xf32>, vector<8x128xf32> -> vector<8x128xf32>
    %c0_4 = arith.constant 0 : index
    %c0_5 = arith.constant 0 : index
    %4 = vector.load %arg3[%c0_4, %c0_5] : memref<1x128xf32, #tpu.memory_space<vmem>>, vector<1x128xf32>
    %5 = vector.broadcast %4 : vector<1x128xf32> to vector<8x128xf32>
    %6 = arith.addf %3, %5 : vector<8x128xf32>
    %7 = math.tanh %6 : vector<8x128xf32>
    %c0_6 = arith.constant 0 : index
    %c0_7 = arith.constant 0 : index
    %8 = vector.load %arg4[%c0_6, %c0_7] : memref<1x128xf32, #tpu.memory_space<vmem>>, vector<1x128xf32>
    %9 = vector.broadcast %8 : vector<1x128xf32> to vector<8x128xf32>
    %10 = arith.mulf %7, %9 : vector<8x128xf32>
    %cst_8 = arith.constant dense<0.000000e+00> : vector<8xf32>
    %11 = vector.multi_reduction <add>, %10, %cst_8 [1] : vector<8x128xf32> to vector<8xf32>
    %12 = vector.shape_cast %11 : vector<8xf32> to vector<8x1xf32>
    %13 = vector.shape_cast %12 : vector<8x1xf32> to vector<1x8x1xf32>
    %cst_9 = arith.constant dense<0xFF800000> : vector<1x1xf32>
    %14 = vector.multi_reduction <maximumf>, %13, %cst_9 [1] : vector<1x8x1xf32> to vector<1x1xf32>
    %15 = vector.shape_cast %14 : vector<1x1xf32> to vector<1x1x1xf32>
    %16 = vector.broadcast %15 : vector<1x1x1xf32> to vector<1x8x1xf32>
    %17 = arith.subf %13, %16 : vector<1x8x1xf32>
    %18 = math.exp %17 : vector<1x8x1xf32>
    %cst_10 = arith.constant dense<0.000000e+00> : vector<1x1xf32>
    %19 = vector.multi_reduction <add>, %18, %cst_10 [1] : vector<1x8x1xf32> to vector<1x1xf32>
    %20 = vector.shape_cast %19 : vector<1x1xf32> to vector<1x1x1xf32>
    %21 = vector.broadcast %20 : vector<1x1x1xf32> to vector<1x8x1xf32>
    %22 = arith.divf %18, %21 : vector<1x8x1xf32>
    %23 = vector.broadcast %22 : vector<1x8x1xf32> to vector<1x8x32xf32>
    %24 = arith.mulf %23, %0 : vector<1x8x32xf32>
    %cst_11 = arith.constant dense<0.000000e+00> : vector<1x32xf32>
    %25 = vector.multi_reduction <add>, %24, %cst_11 [1] : vector<1x8x32xf32> to vector<1x32xf32>
    %26 = vector.shape_cast %25 : vector<1x32xf32> to vector<1x1x32xf32>
    %c0_12 = arith.constant 0 : index
    %c0_13 = arith.constant 0 : index
    %c0_14 = arith.constant 0 : index
    %27 = vector.load %arg5[%c0_12, %c0_13, %c0_14] : memref<1x1x32xf32, #tpu.memory_space<vmem>>, vector<1x1x32xf32>
    tpu.vector_store %arg5[%c0_12, %c0_13, %c0_14], %26 {strides = array<i32>} : memref<1x1x32xf32, #tpu.memory_space<vmem>>, vector<1x1x32xf32>,
    return
  }
  func.func @transform_0(%arg0: i32) -> (i32, i32, i32) {
    %c0_i32 = arith.constant 0 : i32
    %c0_i32_0 = arith.constant 0 : i32
    %c0_i32_1 = arith.constant 0 : i32
    return %arg0, %c0_i32, %c0_i32_0 : i32, i32, i32
  }
  func.func @transform_1(%arg0: i32) -> (i32, i32) {
    %c0_i32 = arith.constant 0 : i32
    %c0_i32_0 = arith.constant 0 : i32
    %c0_i32_1 = arith.constant 0 : i32
    return %c0_i32, %c0_i32_0 : i32, i32
  }
  func.func @transform_2(%arg0: i32) -> (i32, i32) {
    %c0_i32 = arith.constant 0 : i32
    %c0_i32_0 = arith.constant 0 : i32
    %c0_i32_1 = arith.constant 0 : i32
    return %c0_i32, %c0_i32_0 : i32, i32
  }
  func.func @transform_3(%arg0: i32) -> (i32, i32) {
    %c0_i32 = arith.constant 0 : i32
    %c0_i32_0 = arith.constant 0 : i32
    %c0_i32_1 = arith.constant 0 : i32
    return %c0_i32, %c0_i32_0 : i32, i32
  }
  func.func @transform_4(%arg0: i32) -> (i32, i32, i32) {
    %c0_i32 = arith.constant 0 : i32
    %c0_i32_0 = arith.constant 0 : i32
    %c0_i32_1 = arith.constant 0 : i32
    return %arg0, %c0_i32, %c0_i32_0 : i32, i32, i32
  }
}

module attributes {stable_mosaic.version = 11 : i64} {
  func.func @attention_head_kernel(%arg0: i32, %arg1: memref<1x8x32xf32, #tpu.memory_space<vmem>>, %arg2: memref<32x128xf32, #tpu.memory_space<vmem>>, %arg3: memref<1x128xf32, #tpu.memory_space<vmem>>, %arg4: memref<1x128xf32, #tpu.memory_space<vmem>>, %arg5: memref<1x1x32xf32, #tpu.memory_space<vmem>>) attributes {dimension_semantics = [#tpu.dimension_semantics<parallel>], iteration_bounds = array<i64: 2>, scalar_prefetch = 0 : i64, scratch_operands = 0 : i64, tpu.core_type = #tpu.core_type<tc>, window_params = [{transform_indices = @transform_0, window_bounds = array<i64: 1, 8, 32>}, {pipeline_mode = #tpu.pipeline_mode<synchronous>, transform_indices = @transform_1, window_bounds = array<i64: 32, 128>}, {pipeline_mode = #tpu.pipeline_mode<synchronous>, transform_indices = @transform_2, window_bounds = array<i64: 1, 128>}, {pipeline_mode = #tpu.pipeline_mode<synchronous>, transform_indices = @transform_3, window_bounds = array<i64: 1, 128>}, {transform_indices = @transform_4, window_bounds = array<i64: 1, 1, 32>}]} {
    %c0 = arith.constant 0 : index
    %c0_0 = arith.constant 0 : index
    %c0_1 = arith.constant 0 : index
    %0 = vector.load %arg1[%c0, %c0_0, %c0_1] : memref<1x8x32xf32, #tpu.memory_space<vmem>>, vector<1x8x32xf32>
    %1 = vector.shape_cast %0 : vector<1x8x32xf32> to vector<8x32xf32>
    %c0_2 = arith.constant 0 : index
    %c0_3 = arith.constant 0 : index
    %2 = vector.load %arg2[%c0_2, %c0_3] : memref<32x128xf32, #tpu.memory_space<vmem>>, vector<32x128xf32>
    %cst = arith.constant dense<0.000000e+00> : vector<8x128xf32>
    %3 = tpu.matmul %1, %2, %cst {dimension_numbers = #tpu.dot_dimension_numbers<[1], [0], [0], [1], [0, 0, 1, 1], [], []>} : vector<8x32xf32>, vector<32x128xf32>, vector<8x128xf32> -> vector<8x128xf32>
    %c0_4 = arith.constant 0 : index
    %c0_5 = arith.constant 0 : index
    %4 = vector.load %arg3[%c0_4, %c0_5] : memref<1x128xf32, #tpu.memory_space<vmem>>, vector<1x128xf32>
    %5 = vector.broadcast %4 : vector<1x128xf32> to vector<8x128xf32>
    %6 = arith.addf %3, %5 : vector<8x128xf32>
    %7 = math.tanh %6 : vector<8x128xf32>
    %c0_6 = arith.constant 0 : index
    %c0_7 = arith.constant 0 : index
    %8 = vector.load %arg4[%c0_6, %c0_7] : memref<1x128xf32, #tpu.memory_space<vmem>>, vector<1x128xf32>
    %9 = vector.broadcast %8 : vector<1x128xf32> to vector<8x128xf32>
    %10 = arith.mulf %7, %9 : vector<8x128xf32>
    %cst_8 = arith.constant dense<0.000000e+00> : vector<8xf32>
    %11 = vector.multi_reduction <add>, %10, %cst_8 [1] : vector<8x128xf32> to vector<8xf32>
    %12 = vector.shape_cast %11 : vector<8xf32> to vector<8x1xf32>
    %13 = vector.shape_cast %12 : vector<8x1xf32> to vector<1x8x1xf32>
    %cst_9 = arith.constant dense<0xFF800000> : vector<1x1xf32>
    %14 = vector.multi_reduction <maximumf>, %13, %cst_9 [1] : vector<1x8x1xf32> to vector<1x1xf32>
    %15 = vector.shape_cast %14 : vector<1x1xf32> to vector<1x1x1xf32>
    %16 = vector.broadcast %15 : vector<1x1x1xf32> to vector<1x8x1xf32>
    %17 = arith.subf %13, %16 : vector<1x8x1xf32>
    %18 = math.exp %17 : vector<1x8x1xf32>
    %cst_10 = arith.constant dense<0.000000e+00> : vector<1x1xf32>
    %19 = vector.multi_reduction <add>, %18, %cst_10 [1] : vector<1x8x1xf32> to vector<1x1xf32>
    %20 = vector.shape_cast %19 : vector<1x1xf32> to vector<1x1x1xf32>
    %21 = vector.broadcast %20 : vector<1x1x1xf32> to vector<1x8x1xf32>
    %22 = arith.divf %18, %21 : vector<1x8x1xf32>
    %23 = vector.broadcast %22 : vector<1x8x1xf32> to vector<1x8x32xf32>
    %24 = arith.mulf %23, %0 : vector<1x8x32xf32>
    %cst_11 = arith.constant dense<0.000000e+00> : vector<1x32xf32>
    %25 = vector.multi_reduction <add>, %24, %cst_11 [1] : vector<1x8x32xf32> to vector<1x32xf32>
    %26 = vector.shape_cast %25 : vector<1x32xf32> to vector<1x1x32xf32>
    %c0_12 = arith.constant 0 : index
    %c0_13 = arith.constant 0 : index
    %c0_14 = arith.constant 0 : index
    %27 = vector.load %arg5[%c0_12, %c0_13, %c0_14] : memref<1x1x32xf32, #tpu.memory_space<vmem>>, vector<1x1x32xf32>
    tpu.vector_store %arg5[%c0_12, %c0_13, %c0_14], %26 {strides = array<i32>} : memref<1x1x32xf32, #tpu.memory_space<vmem>>, vector<1x1x32xf32>,
    return
  }
  func.func @transform_0(%arg0: i32) -> (i32, i32, i32) {
    %c0_i32 = arith.constant 0 : i32
    %c0_i32_0 = arith.constant 0 : i32
    %c0_i32_1 = arith.constant 0 : i32
    return %arg0, %c0_i32, %c0_i32_0 : i32, i32, i32
  }
  func.func @transform_1(%arg0: i32) -> (i32, i32) {
    %c0_i32 = arith.constant 0 : i32
    %c0_i32_0 = arith.constant 0 : i32
    %c0_i32_1 = arith.constant 0 : i32
    return %c0_i32, %c0_i32_0 : i32, i32
  }
  func.func @transform_2(%arg0: i32) -> (i32, i32) {
    %c0_i32 = arith.constant 0 : i32
    %c0_i32_0 = arith.constant 0 : i32
    %c0_i32_1 = arith.constant 0 : i32
    return %c0_i32, %c0_i32_0 : i32, i32
  }
  func.func @transform_3(%arg0: i32) -> (i32, i32) {
    %c0_i32 = arith.constant 0 : i32
    %c0_i32_0 = arith.constant 0 : i32
    %c0_i32_1 = arith.constant 0 : i32
    return %c0_i32, %c0_i32_0 : i32, i32
  }
  func.func @transform_4(%arg0: i32) -> (i32, i32, i32) {
    %c0_i32 = arith.constant 0 : i32
    %c0_i32_0 = arith.constant 0 : i32
    %c0_i32_1 = arith.constant 0 : i32
    return %arg0, %c0_i32, %c0_i32_0 : i32, i32, i32
  }
}

</mosaic_0001>

<bundles_post_ra>
// kernel: tpu_custom_call.1
= control target key start
LH: loop header
LB: loop body
LE: loop exit
PB: predicated region body
PF: predicated region fallthrough
CT: control target
= control target key end

     0   :  { %9 = vsyncpa [#allocation3], 0  ;;  %s913_s0 = inlined_call_operand.hbm [shape: f32[2,8,32], index: 0, kind: input, shape index: {}]   ;;  %s914_s1 = inlined_call_operand.hbm [shape: f32[32,128], index: 1, kind: input, shape index: {}]   ;;  %s915_s2 = inlined_call_operand.vmem [shape: f32[1,128], index: 2, kind: input, shape index: {}]   ;;  %s916_s3 = inlined_call_operand.vmem [shape: f32[1,128], index: 3, kind: input, shape index: {}]   ;;  %s917_s4 = inlined_call_operand.hbm [shape: f32[2,1,32], index: 4, kind: output, shape index: {}]  }
   0x1   :  { %11 = vsyncpa [#allocation3 + $0x1], 0 }
   0x2   :  { %12 = vsyncpa [#allocation6], 0 }
   0x3   :  { %13 = vsyncpa [#allocation4], 0 }
   0x4   :  { %15 = vsyncpa [#allocation4 + $0x1], 0  ;;  %s708_s15 = smov 0   ;;  %s710_s16 = smov 0  }
   0x5   :  { %s712_s17 = smov 0   ;;  %s714_s18 = smov 0  }
   0x6 LB: > { %s729_s19 = sadd.s32 4294967295, %s673_s18   ;;  %s440_s20 = sadd.s32 4294967294, %s673_s18   ;;  %s673_s18 = sphi %s714_s18, %s937_s18   ;;  %s669_s17 = sphi %s712_s17, %s936_s17   ;;  %s665_s16 = sphi %s710_s16, %s935_s16   ;;  %s661_s15 = sphi %s708_s15, %s934_s15  }
   0x7   : > { %p41_p0 = scmp.ne.s32.totalorder %s665_s16, %s661_s15  ;;  %p918_p1 = scmp.eq.s32.totalorder %s729_s19, 0 }
   0x8   : > { %p134_p3 = scmp.eq.s32.totalorder %s440_s20, 1  ;;  %p441_p5 = scmp.ge.s32.totalorder %s673_s18, 1 }
   0x9   : > { %p738_p4 = por %p918_p1, %p41_p0  ;;  %p141_p7 = scmp.lt.s32.totalorder %s673_s18, 3 }
   0xa   : > { %p743_p6 = por %p134_p3, %p41_p0  ;;  %s675_s24 = smov [#allocation5]  }
   0xb   : > { %s921_s21 = scalar_select %p738_p4, 1, 0 }
   0xc   : > { %s922_s22 = scalar_select %p743_p6, 1, 0 }
   0xd   : > { %p748_p8 = pnand %p441_p5, %p141_p7  ;;  %s153_s25 = sshll.u32 %s675_s24, 4  ;;  %s752_s25 = int_to_ptr.vmem [resolvable:$true] %s153_s25 }
   0xe   : > { %s764_s27 = sadd.s32 1, %s673_s18   ;;  %s28_s28 = sadd.s32 1, %s669_s17 }
   0xf   : > { %s923_s23 = scalar_select %p748_p8, 1, 0 }
  0x10   : > { %p485_p9 = pneg %p748_p8  ;;  %s25_s29 = ssub.s32 %s673_s18, %s764_s27 }
  0x11   : > { %s545_s6 = scalar_lea.hbm %s914_s1, 512 }
  0x12   : > { %p759_p11 = pnand %p485_p9, %p918_p1  ;;  %p546_p12 = scmp.ne.s32.totalorder %s914_s1, %s545_s6 }
  0x13   : > { %p552_p5 = scmp.lt.u32.totalorder %s545_s6, %s914_s1 }
  0x14   : > { %p547_p13 = pneg %p759_p11 }
  0x16   : > { %p548_p0 = pnand %p547_p13, %p546_p12 }
  0x18   : > { %p549_p3 = pneg %p548_p0 }
  0x1a   : > { %p554_p7 = pnand %p552_p5, %p549_p3 }
  0x1c   : > { %557 = shalt.err (!%p554_p7)
}
  0x1d   : > { %s558_s11 = scalar_lea.vmem %s752_s25, 512  ;;  %p566_p2 = scmp.lt.s32.totalorder %s752_s25, %s752_s25 }
  0x1e   : > { %p559_p9 = scmp.ne.s32.totalorder %s752_s25, %s558_s11  ;;  %p567_p6 = scmp.lt.s32.totalorder %s558_s11, %s558_s11 }
  0x20   : > { %p561_p10 = pnand %p559_p9, %p547_p13  ;;  %p568_p4 = por %p567_p6, %p566_p2 }
  0x22   : > { %p562_p1 = pneg %p561_p10 }
  0x24   : > { %p569_p8 = pnand %p568_p4, %p562_p1 }
  0x26   : > { %572 = shalt.err (!%p569_p8)
}
  0x27   : > { %s676_s12 = smov 128   ;;  %s677_s13 = smov 8  }
  0x28   : > { %488 = dma.hbm_to_vmem [thread:$0]  (!%p759_p11), %s914_s1, 512, %s752_s25, [#allocation6], %s676_s12, %s676_s12, %s677_s13  }
  0x29   : > { %p26_p2 = scmp.eq.s32.totalorder %s25_s29, 0  ;;  %p35_p1 = scmp.ne.s32.totalorder %s669_s17, %s665_s16 }
  0x2a   : > { %p36_p4 = scmp.eq.s32.totalorder %s673_s18, 0  ;;  %p498_p6 = scmp.lt.s32.totalorder %s673_s18, 2 }
  0x2b   : > { %s795_s24 = scalar_select %p26_p2, %s669_s17, %s28_s28  }
  0x2c   : > { %p37_p8 = por %p36_p4, %p35_p1  ;;  %p925_p10 = scmp.eq.s32.totalorder %s729_s19, 1 }
  0x2d   : > { %s173_s5 = sand.u32 1, %s669_s17   ;;  %s445_s6 = sshll.u32 %s673_s18, 7 }
  0x2e   : > { %p799_p12 = por %p925_p10, %p35_p1  ;;  %s444_s7 = sshll.u32 %s173_s5, 3 }
  0x2f   : > { %s808_s9 = scalar_lea.hbm %s913_s0, %s445_s6  ;;  %s177_s25 = scalar_lea.vmem [#allocation2], %s444_s7 }
  0x30   : > { %s184_s28 = sshll.u32 %s177_s25, 4  ;;  %p810_p11 = pnand %p498_p6, %p37_p8  ;;  %s814_s28 = int_to_ptr.vmem [resolvable:$true] %s184_s28 }
  0x31   : > { %s174_s10 = scalar_lea.sflag [#allocation3], %s173_s5  ;;  %s573_s11 = scalar_lea.hbm %s808_s9, 128 }
  0x32   : > { %p574_p13 = scmp.ne.s32.totalorder %s808_s9, %s573_s11  ;;  %p575_p0 = pneg %p810_p11 }
  0x33   : > { %s578_s14 = scalar_lea.hbm %s913_s0, 256  ;;  %p579_p7 = scmp.lt.u32.totalorder %s808_s9, %s913_s0 }
  0x34   : > { %p576_p3 = pnand %p575_p0, %p574_p13  ;;  %p580_p9 = scmp.lt.u32.totalorder %s578_s14, %s573_s11 }
  0x35   : > { %p582_p1 = scmp.lt.u32.totalorder %s573_s11, %s808_s9 }
  0x36   : > { %p577_p5 = pneg %p576_p3  ;;  %p581_p2 = por %p580_p9, %p579_p7 }
  0x38   : > { %p583_p4 = por %p582_p1, %p581_p2 }
  0x3a   : > { %p584_p6 = pnand %p583_p4, %p577_p5 }
  0x3c   : > { %587 = shalt.err (!%p584_p6)
}
  0x3d   : > { %s588_s5 = scalar_lea.vmem %s814_s28, 128  ;;  %s678_s7 = smov [#allocation2]  }
  0x3e   : > { %p589_p8 = scmp.ne.s32.totalorder %s814_s28, %s588_s5  ;;  %s593_s26 = sshll.u32 %s678_s7, 4  ;;  %s594_s26 = int_to_ptr.vmem [resolvable:$false] %s593_s26 }
  0x3f   : > { %s595_s8 = scalar_lea.vmem %s594_s26, 256  ;;  %p596_p3 = scmp.lt.s32.totalorder %s814_s28, %s594_s26 }
  0x40   : > { %p591_p10 = pnand %p589_p8, %p575_p0  ;;  %p597_p7 = scmp.lt.s32.totalorder %s595_s8, %s588_s5 }
  0x42   : > { %p592_p13 = pneg %p591_p10  ;;  %p598_p9 = por %p597_p7, %p596_p3 }
  0x44   : > { %p599_p2 = pnand %p598_p9, %p592_p13 }
  0x46   : > { %602 = shalt.err (!%p599_p2)
}
  0x47   : > { %492 = dma.hbm_to_vmem [thread:$0]  (!%p810_p11), %s808_s9, 128, %s814_s28, %s174_s10  }
  0x48   : > { %p928_p5 = scmp.ne.s32.totalorder %s923_s23, 0 }
  0x49   : > { %s844_s25 = sand.u32 (!%p928_p5), 1, %s665_s16   ;;  %p929_p0 = scmp.ne.s32.totalorder (!%p928_p5), %s921_s21, 0 }
  0x4a   : > { %193 = sbr.rel (%p928_p5) target bundleno = 545 (0x221), region = 36  ;;  %s447_s11 = sshll.u32 (!%p928_p5), %s844_s25, 3 }
  0x4b   : > { %s196_s12 = scalar_lea.sflag (!%p928_p5), [#allocation3], %s844_s25  ;;  %s199_s13 = scalar_lea.vmem (!%p928_p5), [#allocation2], %s447_s11 }
  0x51   : > { %648 = dma.done.wait (%p929_p0), %s196_s12, 128  }
  0x52   : > { %650 = vsyncadd (%p929_p0), %s196_s12, 4294967168  ;;  %p930_p1 = scmp.eq.s32.totalorder %s729_s19, 0 }
  0x54   : > { %652 = dma.done.wait (%p930_p1), [#allocation6], 512   ;;  %p931_p11 = pmov %p930_p1 }
  0x55   : > { %v679_v0 = vmov 0.0|0.0   ;;  %vm680_vm0 = vmmov 0   ;;  %v681_v1 = vmov 0.0   ;;  %v228_v2 = vld [vmem:[#allocation5] sm:$0xff]  ;;  %v229_v3 = vld [vmem:[#allocation5 + $0x8] sm:$0xff]  ;;  %v230_v4 = vld [vmem:[#allocation5 + $0x10] sm:$0xff] }
  0x56   : > { %654 = vsyncadd (%p931_p11), [#allocation6], 4294966784  ;;  %471 = vmatprep.subr.bf16.mxu0 %v679_v0  ;;  %468 = vmatprep.mubr.msk.f32.mxu0 %vm680_vm0, %v681_v1  ;;  %v472_v5 = vpack.c.bf16 %v229_v3, %v228_v2  ;;  %v231_v6 = vld [vmem:[#allocation5 + $0x18] sm:$0xff]  ;;  %vm239_vm1 = vcmask 261120   ;;  %v449_v9 = vld [vmem:[%s915_s2] ss:$0 sm:$0xff] }
  0x57   : > { %v475_v7 = vpack.c.bf16 %v231_v6, %v230_v4  ;;  %v227_v8 = vld [vmem:[%s199_s13] sm:$0xff]  ;;  %s452_s29 = sshll.u32 %s729_s19, 4  ;;  %s226_s10 = scalar_lea.vmem [#allocation7], %s844_s25  ;;  %vm349_vm2 = vcmask 253952  }
  0x58   : > { %473 = vmatpush3.bf16.msra.mxu0 %v472_v5  ;;  %v451_v13 = vld [vmem:[%s916_s3] ss:$0 sm:$0xff]  ;;  %s364_s14 = sshll.u32 %s226_s10, 4  ;;  %s869_s5 = scalar_lea.hbm %s917_s4, %s452_s29  ;;  %s871_s14 = int_to_ptr.vmem [resolvable:$true] %s364_s14 }
  0x59   : > { %474 = vmatprep.subr.bf16.mxu0 %v679_v0  ;;  %s352_s7 = scalar_lea.sflag [#allocation4], %s844_s25  ;;  %s603_s26 = scalar_lea.vmem %s871_s14, 16 }
  0x5a   : > { %p604_p4 = scmp.ne.s32.totalorder %s871_s14, %s603_s26  ;;  %s682_s19 = smov [#allocation7]  }
  0x5b   : > { %s607_s8 = sshll.u32 %s682_s19, 4  ;;  %s608_s8 = int_to_ptr.vmem [resolvable:$false] %s607_s8 }
  0x5c   : > { %476 = vmatpush3.bf16.msra.mxu0 %v475_v7  ;;  %p605_p6 = pnand %p604_p4, %p799_p12  ;;  %s609_s11 = scalar_lea.vmem %s608_s8, 32 }
  0x5d   : > { %p610_p10 = scmp.lt.s32.totalorder %s871_s14, %s608_s8  ;;  %p611_p13 = scmp.lt.s32.totalorder %s609_s11, %s603_s26 }
  0x5e   : > { %p606_p8 = pneg %p605_p6 }
  0x5f   : > { %469 = vmatmul.mubr.msk.f32.vlgmr.msra.gmra.mrb[0].mxu0 %vm239_vm1, %v227_v8  ;;  %p612_p3 = por %p611_p13, %p610_p10 }
  0x61   : > { %p613_p7 = pnand %p612_p3, %p606_p8 }
 0x132   : > { %v309_v10 = vpop.f32.mrb[0].mxu0 }
 0x133   : > { %v310_v11 = vadd.f32 %v449_v9, %v309_v10  ;;  %v470_v12 = vpop.f32.mrb[1].mxu0 }
 0x135   : > { %539 = vtanh.f32 %v310_v11 }
 0x13f   : > { %v540_v14 = vpop.eup %539 }
 0x140   : > { %v321_v15 = vmul.f32 %v540_v14, %v451_v13 }
 0x142   : > { %322 = vadd.xlane.f32.xlu0 %v321_v15 }
 0x1cf   : > { %v323_v16 = vpop.xlane.xlu0 %322 }
 0x1d0   : > { %v324_v17 = vrot.slane %v323_v16, 4 }
 0x1d2   : > { %v325_v18 = vmax.f32 %v323_v16, %v324_v17 }
 0x1d4   : > { %v326_v19 = vrot.slane %v325_v18, 2 }
 0x1d6   : > { %v327_v20 = vmax.f32 %v325_v18, %v326_v19 }
 0x1d8   : > { %v328_v21 = vrot.slane %v327_v20, 1 }
 0x1da   : > { %v329_v22 = vmax.f32 %v327_v20, %v328_v21 }
 0x1dc   : > { %v330_v23 = vsub.f32 %v323_v16, %v329_v22 }
 0x1de   : > { %v331_v24 = vmul.f32 1.442695, %v330_v23 }
 0x1e0   : > { %541 = vpow2.f32 %v331_v24 }
 0x1ea   : > { %v542_v25 = vpop.eup %541 }
 0x1eb   : > { %v333_v26 = vrot.slane %v542_v25, 4 }
 0x1ed   : > { %v334_v27 = vadd.f32 %v542_v25, %v333_v26 }
 0x1ef   : > { %v335_v28 = vrot.slane %v334_v27, 2 }
 0x1f1   : > { %v336_v29 = vadd.f32 %v335_v28, %v334_v27 }
 0x1f3   : > { %v337_v30 = vrot.slane %v336_v29, 1 }
 0x1f5   : > { %v338_v31 = vadd.f32 %v337_v30, %v336_v29 }
 0x1f7   : > { %543 = vrcp.f32 %v338_v31 }
 0x201   : > { %v544_v32 = vpop.eup %543 }
 0x202   : > { %v340_v33 = vmul.f32 %v544_v32, %v542_v25 }
 0x204   : > { %v341_v34 = vmul.f32 %v340_v33, %v227_v8 }
 0x206   : > { %v342_v35 = vsel %vm239_vm1, %v341_v34, 0.0 }
 0x207   : > { %v343_v36 = vrot.slane %v342_v35, 4 }
 0x209   : > { %v344_v37 = vadd.f32 %v343_v36, %v342_v35 }
 0x20b   : > { %v345_v38 = vrot.slane %v344_v37, 2 }
 0x20d   : > { %v346_v39 = vadd.f32 %v345_v38, %v344_v37 }
 0x20f   : > { %v347_v40 = vrot.slane %v346_v39, 1 }
 0x211   : > { %v348_v41 = vadd.f32 %v347_v40, %v346_v39 }
 0x213   : > { %350 = vst.msk [vmem:[%s226_s10] sm:$0x1] %vm349_vm2, %v348_v41 }
 0x214   : > { %616 = shalt.err (!%p613_p7)
}
 0x215   : > { %s617_s25 = scalar_lea.hbm %s869_s5, 16  ;;  %s621_s21 = scalar_lea.hbm %s917_s4, 32 }
 0x216   : > { %p618_p9 = scmp.ne.s32.totalorder %s869_s5, %s617_s25  ;;  %p622_p0 = scmp.lt.u32.totalorder %s869_s5, %s917_s4 }
 0x217   : > { %p623_p1 = scmp.lt.u32.totalorder %s621_s21, %s617_s25  ;;  %p625_p4 = scmp.lt.u32.totalorder %s617_s25, %s869_s5 }
 0x218   : > { %p619_p2 = pnand %p618_p9, %p799_p12 }
 0x219   : > { %p624_p11 = por %p623_p1, %p622_p0 }
 0x21a   : > { %p620_p5 = pneg %p619_p2 }
 0x21b   : > { %p626_p6 = por %p625_p4, %p624_p11 }
 0x21d   : > { %p627_p8 = pnand %p626_p6, %p620_p5 }
 0x21f   : > { %630 = shalt.err (!%p627_p8)
}
 0x220   : > { %483 = dma.vmem_to_hbm [thread:$0]  (%p799_p12), %s871_s14, 16, %s869_s5, %s352_s7  }
 0x221 PF: > { %s376_s28 = sand.u32 1, %s661_s15   ;;  %p932_p10 = scmp.ne.s32.totalorder %s922_s22, 0 }
 0x222   : > { %p933_p13 = scmp.ge.s32.totalorder %s673_s18, 2  ;;  %s377_s29 = scalar_lea.sflag [#allocation4], %s376_s28 }
 0x224   : > { %p494_p3 = pnand %p933_p13, %p932_p10 }
 0x226   : > { %656 = dma.done.wait (!%p494_p3), %s377_s29, 16  }
 0x227   : > { %658 = vsyncadd (!%p494_p3), %s377_s29, 4294967280  ;;  %p18_p7 = scmp.ge.s32.totalorder %s764_s27, 4   ;;  %s934_s15 = smov %s665_s16 }
 0x228   : > { %s935_s16 = smov %s669_s17  ;;  %s936_s17 = smov %s795_s24 }
 0x229   : > { %s937_s18 = smov %s764_s27  ;;  %20 = sbr.rel (!%p18_p7) target bundleno = 6 (0x6), region = 85 }
 0x230   :  { %381 = vsyncpa [#allocation3], 1 }
 0x231   :  { %383 = vsyncpa [#allocation3 + $0x1], 1 }
 0x232   :  { %384 = vsyncpa [#allocation6], 1 }
 0x233   :  { %385 = vsyncpa [#allocation4], 1 }
 0x234   :  { %387 = vsyncpa [#allocation4 + $0x1], 1 }

// kernel: tpu_custom_call.1
= control target key start
LH: loop header
LB: loop body
LE: loop exit
PB: predicated region body
PF: predicated region fallthrough
CT: control target
= control target key end

     0   :  { %9 = vsyncpa [#allocation3], 0  ;;  %s913_s0 = inlined_call_operand.hbm [shape: f32[2,8,32], index: 0, kind: input, shape index: {}]   ;;  %s914_s1 = inlined_call_operand.hbm [shape: f32[32,128], index: 1, kind: input, shape index: {}]   ;;  %s915_s2 = inlined_call_operand.vmem [shape: f32[1,128], index: 2, kind: input, shape index: {}]   ;;  %s916_s3 = inlined_call_operand.vmem [shape: f32[1,128], index: 3, kind: input, shape index: {}]   ;;  %s917_s4 = inlined_call_operand.hbm [shape: f32[2,1,32], index: 4, kind: output, shape index: {}]  }
   0x1   :  { %11 = vsyncpa [#allocation3 + $0x1], 0 }
   0x2   :  { %12 = vsyncpa [#allocation6], 0 }
   0x3   :  { %13 = vsyncpa [#allocation4], 0 }
   0x4   :  { %15 = vsyncpa [#allocation4 + $0x1], 0  ;;  %s708_s15 = smov 0   ;;  %s710_s16 = smov 0  }
   0x5   :  { %s712_s17 = smov 0   ;;  %s714_s18 = smov 0  }
   0x6 LB: > { %s729_s19 = sadd.s32 4294967295, %s673_s18   ;;  %s440_s20 = sadd.s32 4294967294, %s673_s18   ;;  %s673_s18 = sphi %s714_s18, %s937_s18   ;;  %s669_s17 = sphi %s712_s17, %s936_s17   ;;  %s665_s16 = sphi %s710_s16, %s935_s16   ;;  %s661_s15 = sphi %s708_s15, %s934_s15  }
   0x7   : > { %p41_p0 = scmp.ne.s32.totalorder %s665_s16, %s661_s15  ;;  %p918_p1 = scmp.eq.s32.totalorder %s729_s19, 0 }
   0x8   : > { %p134_p3 = scmp.eq.s32.totalorder %s440_s20, 1  ;;  %p441_p5 = scmp.ge.s32.totalorder %s673_s18, 1 }
   0x9   : > { %p738_p4 = por %p918_p1, %p41_p0  ;;  %p141_p7 = scmp.lt.s32.totalorder %s673_s18, 3 }
   0xa   : > { %p743_p6 = por %p134_p3, %p41_p0  ;;  %s675_s24 = smov [#allocation5]  }
   0xb   : > { %s921_s21 = scalar_select %p738_p4, 1, 0 }
   0xc   : > { %s922_s22 = scalar_select %p743_p6, 1, 0 }
   0xd   : > { %p748_p8 = pnand %p441_p5, %p141_p7  ;;  %s153_s25 = sshll.u32 %s675_s24, 4  ;;  %s752_s25 = int_to_ptr.vmem [resolvable:$true] %s153_s25 }
   0xe   : > { %s764_s27 = sadd.s32 1, %s673_s18   ;;  %s28_s28 = sadd.s32 1, %s669_s17 }
   0xf   : > { %s923_s23 = scalar_select %p748_p8, 1, 0 }
  0x10   : > { %p485_p9 = pneg %p748_p8  ;;  %s25_s29 = ssub.s32 %s673_s18, %s764_s27 }
  0x11   : > { %s545_s6 = scalar_lea.hbm %s914_s1, 512 }
  0x12   : > { %p759_p11 = pnand %p485_p9, %p918_p1  ;;  %p546_p12 = scmp.ne.s32.totalorder %s914_s1, %s545_s6 }
  0x13   : > { %p552_p5 = scmp.lt.u32.totalorder %s545_s6, %s914_s1 }
  0x14   : > { %p547_p13 = pneg %p759_p11 }
  0x16   : > { %p548_p0 = pnand %p547_p13, %p546_p12 }
  0x18   : > { %p549_p3 = pneg %p548_p0 }
  0x1a   : > { %p554_p7 = pnand %p552_p5, %p549_p3 }
  0x1c   : > { %557 = shalt.err (!%p554_p7)
}
  0x1d   : > { %s558_s11 = scalar_lea.vmem %s752_s25, 512  ;;  %p566_p2 = scmp.lt.s32.totalorder %s752_s25, %s752_s25 }
  0x1e   : > { %p559_p9 = scmp.ne.s32.totalorder %s752_s25, %s558_s11  ;;  %p567_p6 = scmp.lt.s32.totalorder %s558_s11, %s558_s11 }
  0x20   : > { %p561_p10 = pnand %p559_p9, %p547_p13  ;;  %p568_p4 = por %p567_p6, %p566_p2 }
  0x22   : > { %p562_p1 = pneg %p561_p10 }
  0x24   : > { %p569_p8 = pnand %p568_p4, %p562_p1 }
  0x26   : > { %572 = shalt.err (!%p569_p8)
}
  0x27   : > { %s676_s12 = smov 128   ;;  %s677_s13 = smov 8  }
  0x28   : > { %488 = dma.hbm_to_vmem [thread:$0]  (!%p759_p11), %s914_s1, 512, %s752_s25, [#allocation6], %s676_s12, %s676_s12, %s677_s13  }
  0x29   : > { %p26_p2 = scmp.eq.s32.totalorder %s25_s29, 0  ;;  %p35_p1 = scmp.ne.s32.totalorder %s669_s17, %s665_s16 }
  0x2a   : > { %p36_p4 = scmp.eq.s32.totalorder %s673_s18, 0  ;;  %p498_p6 = scmp.lt.s32.totalorder %s673_s18, 2 }
  0x2b   : > { %s795_s24 = scalar_select %p26_p2, %s669_s17, %s28_s28  }
  0x2c   : > { %p37_p8 = por %p36_p4, %p35_p1  ;;  %p925_p10 = scmp.eq.s32.totalorder %s729_s19, 1 }
  0x2d   : > { %s173_s5 = sand.u32 1, %s669_s17   ;;  %s445_s6 = sshll.u32 %s673_s18, 7 }
  0x2e   : > { %p799_p12 = por %p925_p10, %p35_p1  ;;  %s444_s7 = sshll.u32 %s173_s5, 3 }
  0x2f   : > { %s808_s9 = scalar_lea.hbm %s913_s0, %s445_s6  ;;  %s177_s25 = scalar_lea.vmem [#allocation2], %s444_s7 }
  0x30   : > { %s184_s28 = sshll.u32 %s177_s25, 4  ;;  %p810_p11 = pnand %p498_p6, %p37_p8  ;;  %s814_s28 = int_to_ptr.vmem [resolvable:$true] %s184_s28 }
  0x31   : > { %s174_s10 = scalar_lea.sflag [#allocation3], %s173_s5  ;;  %s573_s11 = scalar_lea.hbm %s808_s9, 128 }
  0x32   : > { %p574_p13 = scmp.ne.s32.totalorder %s808_s9, %s573_s11  ;;  %p575_p0 = pneg %p810_p11 }
  0x33   : > { %s578_s14 = scalar_lea.hbm %s913_s0, 256  ;;  %p579_p7 = scmp.lt.u32.totalorder %s808_s9, %s913_s0 }
  0x34   : > { %p576_p3 = pnand %p575_p0, %p574_p13  ;;  %p580_p9 = scmp.lt.u32.totalorder %s578_s14, %s573_s11 }
  0x35   : > { %p582_p1 = scmp.lt.u32.totalorder %s573_s11, %s808_s9 }
  0x36   : > { %p577_p5 = pneg %p576_p3  ;;  %p581_p2 = por %p580_p9, %p579_p7 }
  0x38   : > { %p583_p4 = por %p582_p1, %p581_p2 }
  0x3a   : > { %p584_p6 = pnand %p583_p4, %p577_p5 }
  0x3c   : > { %587 = shalt.err (!%p584_p6)
}
  0x3d   : > { %s588_s5 = scalar_lea.vmem %s814_s28, 128  ;;  %s678_s7 = smov [#allocation2]  }
  0x3e   : > { %p589_p8 = scmp.ne.s32.totalorder %s814_s28, %s588_s5  ;;  %s593_s26 = sshll.u32 %s678_s7, 4  ;;  %s594_s26 = int_to_ptr.vmem [resolvable:$false] %s593_s26 }
  0x3f   : > { %s595_s8 = scalar_lea.vmem %s594_s26, 256  ;;  %p596_p3 = scmp.lt.s32.totalorder %s814_s28, %s594_s26 }
  0x40   : > { %p591_p10 = pnand %p589_p8, %p575_p0  ;;  %p597_p7 = scmp.lt.s32.totalorder %s595_s8, %s588_s5 }
  0x42   : > { %p592_p13 = pneg %p591_p10  ;;  %p598_p9 = por %p597_p7, %p596_p3 }
  0x44   : > { %p599_p2 = pnand %p598_p9, %p592_p13 }
  0x46   : > { %602 = shalt.err (!%p599_p2)
}
  0x47   : > { %492 = dma.hbm_to_vmem [thread:$0]  (!%p810_p11), %s808_s9, 128, %s814_s28, %s174_s10  }
  0x48   : > { %p928_p5 = scmp.ne.s32.totalorder %s923_s23, 0 }
  0x49   : > { %s844_s25 = sand.u32 (!%p928_p5), 1, %s665_s16   ;;  %p929_p0 = scmp.ne.s32.totalorder (!%p928_p5), %s921_s21, 0 }
  0x4a   : > { %193 = sbr.rel (%p928_p5) target bundleno = 545 (0x221), region = 36  ;;  %s447_s11 = sshll.u32 (!%p928_p5), %s844_s25, 3 }
  0x4b   : > { %s196_s12 = scalar_lea.sflag (!%p928_p5), [#allocation3], %s844_s25  ;;  %s199_s13 = scalar_lea.vmem (!%p928_p5), [#allocation2], %s447_s11 }
  0x51   : > { %648 = dma.done.wait (%p929_p0), %s196_s12, 128  }
  0x52   : > { %650 = vsyncadd (%p929_p0), %s196_s12, 4294967168  ;;  %p930_p1 = scmp.eq.s32.totalorder %s729_s19, 0 }
  0x54   : > { %652 = dma.done.wait (%p930_p1), [#allocation6], 512   ;;  %p931_p11 = pmov %p930_p1 }
  0x55   : > { %v679_v0 = vmov 0.0|0.0   ;;  %vm680_vm0 = vmmov 0   ;;  %v681_v1 = vmov 0.0   ;;  %v228_v2 = vld [vmem:[#allocation5] sm:$0xff]  ;;  %v229_v3 = vld [vmem:[#allocation5 + $0x8] sm:$0xff]  ;;  %v230_v4 = vld [vmem:[#allocation5 + $0x10] sm:$0xff] }
  0x56   : > { %654 = vsyncadd (%p931_p11), [#allocation6], 4294966784  ;;  %471 = vmatprep.subr.bf16.mxu0 %v679_v0  ;;  %468 = vmatprep.mubr.msk.f32.mxu0 %vm680_vm0, %v681_v1  ;;  %v472_v5 = vpack.c.bf16 %v229_v3, %v228_v2  ;;  %v231_v6 = vld [vmem:[#allocation5 + $0x18] sm:$0xff]  ;;  %vm239_vm1 = vcmask 261120   ;;  %v449_v9 = vld [vmem:[%s915_s2] ss:$0 sm:$0xff] }
  0x57   : > { %v475_v7 = vpack.c.bf16 %v231_v6, %v230_v4  ;;  %v227_v8 = vld [vmem:[%s199_s13] sm:$0xff]  ;;  %s452_s29 = sshll.u32 %s729_s19, 4  ;;  %s226_s10 = scalar_lea.vmem [#allocation7], %s844_s25  ;;  %vm349_vm2 = vcmask 253952  }
  0x58   : > { %473 = vmatpush3.bf16.msra.mxu0 %v472_v5  ;;  %v451_v13 = vld [vmem:[%s916_s3] ss:$0 sm:$0xff]  ;;  %s364_s14 = sshll.u32 %s226_s10, 4  ;;  %s869_s5 = scalar_lea.hbm %s917_s4, %s452_s29  ;;  %s871_s14 = int_to_ptr.vmem [resolvable:$true] %s364_s14 }
  0x59   : > { %474 = vmatprep.subr.bf16.mxu0 %v679_v0  ;;  %s352_s7 = scalar_lea.sflag [#allocation4], %s844_s25  ;;  %s603_s26 = scalar_lea.vmem %s871_s14, 16 }
  0x5a   : > { %p604_p4 = scmp.ne.s32.totalorder %s871_s14, %s603_s26  ;;  %s682_s19 = smov [#allocation7]  }
  0x5b   : > { %s607_s8 = sshll.u32 %s682_s19, 4  ;;  %s608_s8 = int_to_ptr.vmem [resolvable:$false] %s607_s8 }
  0x5c   : > { %476 = vmatpush3.bf16.msra.mxu0 %v475_v7  ;;  %p605_p6 = pnand %p604_p4, %p799_p12  ;;  %s609_s11 = scalar_lea.vmem %s608_s8, 32 }
  0x5d   : > { %p610_p10 = scmp.lt.s32.totalorder %s871_s14, %s608_s8  ;;  %p611_p13 = scmp.lt.s32.totalorder %s609_s11, %s603_s26 }
  0x5e   : > { %p606_p8 = pneg %p605_p6 }
  0x5f   : > { %469 = vmatmul.mubr.msk.f32.vlgmr.msra.gmra.mrb[0].mxu0 %vm239_vm1, %v227_v8  ;;  %p612_p3 = por %p611_p13, %p610_p10 }
  0x61   : > { %p613_p7 = pnand %p612_p3, %p606_p8 }
 0x132   : > { %v309_v10 = vpop.f32.mrb[0].mxu0 }
 0x133   : > { %v310_v11 = vadd.f32 %v449_v9, %v309_v10  ;;  %v470_v12 = vpop.f32.mrb[1].mxu0 }
 0x135   : > { %539 = vtanh.f32 %v310_v11 }
 0x13f   : > { %v540_v14 = vpop.eup %539 }
 0x140   : > { %v321_v15 = vmul.f32 %v540_v14, %v451_v13 }
 0x142   : > { %322 = vadd.xlane.f32.xlu0 %v321_v15 }
 0x1cf   : > { %v323_v16 = vpop.xlane.xlu0 %322 }
 0x1d0   : > { %v324_v17 = vrot.slane %v323_v16, 4 }
 0x1d2   : > { %v325_v18 = vmax.f32 %v323_v16, %v324_v17 }
 0x1d4   : > { %v326_v19 = vrot.slane %v325_v18, 2 }
 0x1d6   : > { %v327_v20 = vmax.f32 %v325_v18, %v326_v19 }
 0x1d8   : > { %v328_v21 = vrot.slane %v327_v20, 1 }
 0x1da   : > { %v329_v22 = vmax.f32 %v327_v20, %v328_v21 }
 0x1dc   : > { %v330_v23 = vsub.f32 %v323_v16, %v329_v22 }
 0x1de   : > { %v331_v24 = vmul.f32 1.442695, %v330_v23 }
 0x1e0   : > { %541 = vpow2.f32 %v331_v24 }
 0x1ea   : > { %v542_v25 = vpop.eup %541 }
 0x1eb   : > { %v333_v26 = vrot.slane %v542_v25, 4 }
 0x1ed   : > { %v334_v27 = vadd.f32 %v542_v25, %v333_v26 }
 0x1ef   : > { %v335_v28 = vrot.slane %v334_v27, 2 }
 0x1f1   : > { %v336_v29 = vadd.f32 %v335_v28, %v334_v27 }
 0x1f3   : > { %v337_v30 = vrot.slane %v336_v29, 1 }
 0x1f5   : > { %v338_v31 = vadd.f32 %v337_v30, %v336_v29 }
 0x1f7   : > { %543 = vrcp.f32 %v338_v31 }
 0x201   : > { %v544_v32 = vpop.eup %543 }
 0x202   : > { %v340_v33 = vmul.f32 %v544_v32, %v542_v25 }
 0x204   : > { %v341_v34 = vmul.f32 %v340_v33, %v227_v8 }
 0x206   : > { %v342_v35 = vsel %vm239_vm1, %v341_v34, 0.0 }
 0x207   : > { %v343_v36 = vrot.slane %v342_v35, 4 }
 0x209   : > { %v344_v37 = vadd.f32 %v343_v36, %v342_v35 }
 0x20b   : > { %v345_v38 = vrot.slane %v344_v37, 2 }
 0x20d   : > { %v346_v39 = vadd.f32 %v345_v38, %v344_v37 }
 0x20f   : > { %v347_v40 = vrot.slane %v346_v39, 1 }
 0x211   : > { %v348_v41 = vadd.f32 %v347_v40, %v346_v39 }
 0x213   : > { %350 = vst.msk [vmem:[%s226_s10] sm:$0x1] %vm349_vm2, %v348_v41 }
 0x214   : > { %616 = shalt.err (!%p613_p7)
}
 0x215   : > { %s617_s25 = scalar_lea.hbm %s869_s5, 16  ;;  %s621_s21 = scalar_lea.hbm %s917_s4, 32 }
 0x216   : > { %p618_p9 = scmp.ne.s32.totalorder %s869_s5, %s617_s25  ;;  %p622_p0 = scmp.lt.u32.totalorder %s869_s5, %s917_s4 }
 0x217   : > { %p623_p1 = scmp.lt.u32.totalorder %s621_s21, %s617_s25  ;;  %p625_p4 = scmp.lt.u32.totalorder %s617_s25, %s869_s5 }
 0x218   : > { %p619_p2 = pnand %p618_p9, %p799_p12 }
 0x219   : > { %p624_p11 = por %p623_p1, %p622_p0 }
 0x21a   : > { %p620_p5 = pneg %p619_p2 }
 0x21b   : > { %p626_p6 = por %p625_p4, %p624_p11 }
 0x21d   : > { %p627_p8 = pnand %p626_p6, %p620_p5 }
 0x21f   : > { %630 = shalt.err (!%p627_p8)
}
 0x220   : > { %483 = dma.vmem_to_hbm [thread:$0]  (%p799_p12), %s871_s14, 16, %s869_s5, %s352_s7  }
 0x221 PF: > { %s376_s28 = sand.u32 1, %s661_s15   ;;  %p932_p10 = scmp.ne.s32.totalorder %s922_s22, 0 }
 0x222   : > { %p933_p13 = scmp.ge.s32.totalorder %s673_s18, 2  ;;  %s377_s29 = scalar_lea.sflag [#allocation4], %s376_s28 }
 0x224   : > { %p494_p3 = pnand %p933_p13, %p932_p10 }
 0x226   : > { %656 = dma.done.wait (!%p494_p3), %s377_s29, 16  }
 0x227   : > { %658 = vsyncadd (!%p494_p3), %s377_s29, 4294967280  ;;  %p18_p7 = scmp.ge.s32.totalorder %s764_s27, 4   ;;  %s934_s15 = smov %s665_s16 }
 0x228   : > { %s935_s16 = smov %s669_s17  ;;  %s936_s17 = smov %s795_s24 }
 0x229   : > { %s937_s18 = smov %s764_s27  ;;  %20 = sbr.rel (!%p18_p7) target bundleno = 6 (0x6), region = 85 }
 0x230   :  { %381 = vsyncpa [#allocation3], 1 }
 0x231   :  { %383 = vsyncpa [#allocation3 + $0x1], 1 }
 0x232   :  { %384 = vsyncpa [#allocation6], 1 }
 0x233   :  { %385 = vsyncpa [#allocation4], 1 }
 0x234   :  { %387 = vsyncpa [#allocation4 + $0x1], 1 }

</bundles_post_ra>
